<compile_context>
chip_gen: v6e
topology: v6e:2x2x1
jax: 0.10.0
libtpu: 0.0.40
codegen_flags: <defaults>
</compile_context>

<pallas_src>
import functools

import jax
import jax.numpy as jnp
from jax import lax
from jax.experimental import pallas as pl
from jax.experimental.pallas import tpu as pltpu


def _round_up(x, m):
    return (x + m - 1) // m * m


def _conv_bn_prelu_kernel(xa_ref, xb_ref, w_ref, p_ref, o_ref, win_ref, patch_ref, *,
                          KH, KW, Crow, dh, dw, Wp, TILE_L, bn_acti):
    # xa_ref:    (1, Crow, TILE_L)     current spatial tile of the flat, zero-padded image
    # xb_ref:    (1, Crow, H128)       right halo (next H128 flat columns of the same image)
    # w_ref:     (Cout, KH*KW*Crow)    im2col weights (BN scale pre-folded, zero pad rows)
    # p_ref:     (Cout, 2)             [bn_shift | prelu_alpha]
    # o_ref:     (1, Cout, TILE_L)     flat conv output tile (lane-dense, unmasked stores)
    # win_ref:   (Crow, TILE_L+H128)   tile + halo staged contiguously (aligned stores)
    # patch_ref: (KH*KW*Crow, TILE_L)  im2col patch matrix (sublane-aligned tap slabs)

    # Stage tile + halo contiguously: two full, aligned tile stores.
    win_ref[:, :TILE_L] = xa_ref[0]
    win_ref[:, TILE_L:] = xb_ref[0]

    # Build the im2col patch matrix from contiguous lane-slices of the staged window.
    # All offsets are static; each write covers a full sublane granule (Crow rows).
    for t in range(KH * KW):
        i, j = divmod(t, KW)
        off = i * dh * Wp + j * dw
        patch_ref[pl.ds(t * Crow, Crow), :] = win_ref[:, pl.ds(off, TILE_L)]

    # Single MXU contraction with f32 accumulation: (Cout, K2p) @ (K2p, TILE_L).
    acc = jnp.dot(w_ref[...], patch_ref[...], preferred_element_type=jnp.float32)

    if bn_acti:
        shift = p_ref[:, 0:1]                      # (Cout, 1), broadcast over lanes
        alpha = p_ref[:, 1:2]
        y = acc + shift                            # BN scale already folded into weights
        y = jnp.where(y >= 0.0, y, alpha * y)      # PReLU (per-channel slope)
    else:
        y = acc

    o_ref[0] = y.astype(o_ref.dtype)


def conv_bn_prelu(x_nchw, w_oihw, bn_scale=None, bn_shift=None, prelu_alpha=None, *,
                  stride=(1, 1), padding=(1, 1), dilation=(1, 1),
                  bn_acti=True, compute_dtype=jnp.bfloat16):
    """Conv2d(bias=False) + optional folded BatchNorm2d + PReLU.  NCHW in, NCHW out."""
    N, Cin, H, W = x_nchw.shape
    Cout, Cin_w, KH, KW = w_oihw.shape
    assert Cin_w == Cin, "groups > 1 not supported"  # TODO(synk): grouped/depthwise conv
    sh, sw = stride
    ph, pw = padding
    dh, dw = dilation

    Ho = (H + 2 * ph - dh * (KH - 1) - 1) // sh + 1
    Wo = (W + 2 * pw - dw * (KW - 1) - 1) // sw + 1
    Hp, Wp = H + 2 * ph, W + 2 * pw

    rows_ext = (Ho - 1) * sh + 1                        # input rows spanned by the outputs
    Lp_raw = rows_ext * Wp                              # flat output extent (pre-rounding)
    max_off = (KH - 1) * dh * Wp + (KW - 1) * dw        # largest kernel-tap offset

    # Spatial tile: halo block H128 must divide the tile; keep the output lane extent a
    # large multiple of 128 (>=512 at production sizes; v5e has a single vst slot) while
    # still getting several pipelined grid steps per image at small sizes.
    H128 = _round_up(max(max_off, 1), 128)
    base = 512 if Lp_raw >= 2048 else (256 if Lp_raw >= 512 else 128)
    TILE_L = _round_up(max(base, H128), H128)
    Lp = _round_up(Lp_raw, TILE_L)
    num_l = Lp // TILE_L
    halo_step = TILE_L // H128

    Lin = _round_up(max(Hp * Wp, Lp + H128), TILE_L)    # flat input extent (tile-aligned)

    # Sublane granule: 8 rows for 32-bit, 16 for packed bf16 -> aligned patch-tap stores.
    granule = 8 * (4 // jnp.dtype(compute_dtype).itemsize)
    Crow = _round_up(Cin, granule)
    K2p = KH * KW * Crow

    # ---- Layout plumbing only (no FLOPs): zero-pad halo + channel granule, flatten spatial.
    # TODO(synk): eliminate this HBM-materialized padded activation copy at production
    # resolutions (handle the halo in-kernel or fuse the pad into the pallas_call inputs).
    x_pad = jnp.pad(x_nchw, ((0, 0), (0, Crow - Cin), (ph, ph), (pw, pw)))
    x_flat = x_pad.reshape(N, Crow, Hp * Wp)
    x_flat = jnp.pad(x_flat, ((0, 0), (0, 0), (0, Lin - Hp * Wp))).astype(compute_dtype)

    # im2col-ordered weights, zero-padded to Crow channels per tap; BN scale folded in
    # (scales weights, not activations, so it is numerically safe).
    w = w_oihw
    if bn_acti:
        w = w * bn_scale[:, None, None, None]
    w_t = jnp.transpose(w, (0, 2, 3, 1))                         # (Cout, KH, KW, Cin)
    w_t = jnp.pad(w_t, ((0, 0), (0, 0), (0, 0), (0, Crow - Cin)))
    w2 = w_t.reshape(Cout, K2p).astype(compute_dtype)

    if bn_acti:
        params = jnp.stack([bn_shift, prelu_alpha], axis=1).astype(jnp.float32)  # (Cout, 2)
    else:
        params = jnp.zeros((Cout, 2), jnp.float32)

    kernel = functools.partial(
        _conv_bn_prelu_kernel, KH=KH, KW=KW, Crow=Crow, dh=dh, dw=dw,
        Wp=Wp, TILE_L=TILE_L, bn_acti=bn_acti)

    out_flat = pl.pallas_call(
        kernel,
        out_shape=jax.ShapeDtypeStruct((N, Cout, Lp), x_nchw.dtype),
        grid=(N, num_l),
        in_specs=[
            # Current spatial tile of the flat image.
            pl.BlockSpec((1, Crow, TILE_L), lambda n, l: (n, 0, l)),
            # Right halo: the H128 flat columns immediately after the tile.
            pl.BlockSpec((1, Crow, H128), lambda n, l: (n, 0, (l + 1) * halo_step)),
            # Weights / per-channel params: constant block index -> resident, one DMA.
            pl.BlockSpec((Cout, K2p), lambda n, l: (0, 0)),
            pl.BlockSpec((Cout, 2), lambda n, l: (0, 0)),
        ],
        out_specs=pl.BlockSpec((1, Cout, TILE_L), lambda n, l: (n, 0, l)),
        scratch_shapes=[
            pltpu.VMEM((Crow, TILE_L + H128), compute_dtype),   # staged tile + halo
            pltpu.VMEM((K2p, TILE_L), compute_dtype),           # im2col patch matrix
        ],
        compiler_params=pltpu.CompilerParams(
            dimension_semantics=("parallel", "parallel")),
    )(x_flat, x_flat, w2, params)

    # Crop the flat result back to (N, Cout, Ho, Wo) (NCHW, matching the torch module).
    out = out_flat[:, :, : rows_ext * Wp].reshape(N, Cout, rows_ext, Wp)
    # TODO(synk): stride > 1 computes the dense stride-1 result and crops (sh*sw x extra
    # work); build the patch only at strided positions if strided layers use this path.
    out = out[:, :, ::sh, : (Wo - 1) * sw + 1 : sw]
    return out


def reference(x_nchw, w_oihw, bn_scale, bn_shift, prelu_alpha, *,
              stride=(1, 1), padding=(1, 1), dilation=(1, 1), bn_acti=True):
    y = lax.conv_general_dilated(
        x_nchw, w_oihw, window_strides=stride,
        padding=[(padding[0], padding[0]), (padding[1], padding[1])],
        rhs_dilation=dilation,
        dimension_numbers=("NCHW", "OIHW", "NCHW"),
        precision=lax.Precision.HIGHEST)
    if bn_acti:
        y = y * bn_scale[None, :, None, None] + bn_shift[None, :, None, None]
        y = jnp.where(y >= 0.0, y, prelu_alpha[None, :, None, None] * y)
    return y


if __name__ == "__main__":
    # Module config: Conv(nIn=4, nOut=8, kSize=3, stride=1, padding=1, bn_acti=True, bias=False)
    N, Cin, H, W = 2, 4, 16, 16
    Cout, K = 8, 3
    eps = 1e-3

    key = jax.random.PRNGKey(0)
    kx, kw = jax.random.split(key)

    # PyTorch-style NCHW input (as the module would receive) — consumed directly.
    x_nchw = jax.random.normal(kx, (N, Cin, H, W), dtype=jnp.float32)

    # Conv weight in torch OIHW layout, deterministic init.
    w_oihw = 0.1 * jax.random.normal(kw, (Cout, Cin, K, K), dtype=jnp.float32)

    # BatchNorm2d(Cout, eps=1e-3) parameters (deterministic), folded to scale/shift.
    gamma = 1.0 + 0.05 * jnp.arange(Cout, dtype=jnp.float32)
    beta = 0.02 * jnp.arange(Cout, dtype=jnp.float32)
    running_mean = 0.01 * jnp.arange(Cout, dtype=jnp.float32)
    running_var = 1.0 + 0.1 * jnp.arange(Cout, dtype=jnp.float32)
    bn_scale = gamma / jnp.sqrt(running_var + eps)
    bn_shift = beta - running_mean * bn_scale

    # PReLU(Cout) per-channel slope (torch default 0.25, slightly perturbed).
    alpha = 0.25 + 0.01 * jnp.arange(Cout, dtype=jnp.float32)

    ref = reference(x_nchw, w_oihw, bn_scale, bn_shift, alpha,
                    stride=(1, 1), padding=(1, 1), dilation=(1, 1), bn_acti=True)

    # Default fast path: bf16 operands, f32 accumulation (looser tolerance vs f32 reference).
    out_bf16 = conv_bn_prelu(x_nchw, w_oihw, bn_scale, bn_shift, alpha,
                             stride=(1, 1), padding=(1, 1), dilation=(1, 1),
                             bn_acti=True, compute_dtype=jnp.bfloat16)
    out_bf16 = jax.block_until_ready(out_bf16)
    assert out_bf16.shape == (N, Cout, H, W), out_bf16.shape
    assert jnp.allclose(out_bf16, ref, atol=5e-2, rtol=5e-2), \
        float(jnp.max(jnp.abs(out_bf16 - ref)))

    # f32 path: bit-level parity check with the PyTorch module semantics.
    out_f32 = conv_bn_prelu(x_nchw, w_oihw, bn_scale, bn_shift, alpha,
                            stride=(1, 1), padding=(1, 1), dilation=(1, 1),
                            bn_acti=True, compute_dtype=jnp.float32)
    out_f32 = jax.block_until_ready(out_f32)
    assert out_f32.shape == (N, Cout, H, W), out_f32.shape
    assert jnp.allclose(out_f32, ref, atol=1e-3, rtol=1e-3), \
        float(jnp.max(jnp.abs(out_f32 - ref)))

    print("KERNEL_OK")
</pallas_src>

<mosaic_0001>
module attributes {stable_mosaic.version = 11 : i64} {
  func.func @_conv_bn_prelu_kernel(%arg0: i32, %arg1: i32, %arg2: memref<1x16x128xbf16, #tpu.memory_space<vmem>>, %arg3: memref<1x16x128xbf16, #tpu.memory_space<vmem>>, %arg4: memref<8x144xbf16, #tpu.memory_space<vmem>>, %arg5: memref<8x2xf32, #tpu.memory_space<vmem>>, %arg6: memref<1x8x128xf32, #tpu.memory_space<vmem>>, %arg7: memref<16x256xbf16, #tpu.memory_space<vmem>>, %arg8: memref<144x128xbf16, #tpu.memory_space<vmem>>) attributes {dimension_semantics = [#tpu.dimension_semantics<parallel>, #tpu.dimension_semantics<parallel>], iteration_bounds = array<i64: 2, 3>, scalar_prefetch = 0 : i64, scratch_operands = 2 : i64, tpu.core_type = #tpu.core_type<tc>, window_params = [{transform_indices = @transform_0, window_bounds = array<i64: 1, 16, 128>}, {transform_indices = @transform_1, window_bounds = array<i64: 1, 16, 128>}, {pipeline_mode = #tpu.pipeline_mode<synchronous>, transform_indices = @transform_2, window_bounds = array<i64: 8, 144>}, {pipeline_mode = #tpu.pipeline_mode<synchronous>, transform_indices = @transform_3, window_bounds = array<i64: 8, 2>}, {transform_indices = @transform_4, window_bounds = array<i64: 1, 8, 128>}]} {
    %c0 = arith.constant 0 : index
    %c0_0 = arith.constant 0 : index
    %c0_1 = arith.constant 0 : index
    %0 = vector.load %arg2[%c0, %c0_0, %c0_1] : memref<1x16x128xbf16, #tpu.memory_space<vmem>>, vector<1x16x128xbf16>
    %1 = vector.shape_cast %0 : vector<1x16x128xbf16> to vector<16x128xbf16>
    %c0_2 = arith.constant 0 : index
    %c0_3 = arith.constant 0 : index
    %2 = vector.load %arg7[%c0_2, %c0_3] : memref<16x256xbf16, #tpu.memory_space<vmem>>, vector<16x128xbf16>
    tpu.vector_store %arg7[%c0_2, %c0_3], %1 {strides = array<i32>} : memref<16x256xbf16, #tpu.memory_space<vmem>>, vector<16x128xbf16>,
    %c0_4 = arith.constant 0 : index
    %c0_5 = arith.constant 0 : index
    %c0_6 = arith.constant 0 : index
    %3 = vector.load %arg3[%c0_4, %c0_5, %c0_6] : memref<1x16x128xbf16, #tpu.memory_space<vmem>>, vector<1x16x128xbf16>
    %4 = vector.shape_cast %3 : vector<1x16x128xbf16> to vector<16x128xbf16>
    %c0_7 = arith.constant 0 : index
    %c128 = arith.constant 128 : index
    %5 = vector.load %arg7[%c0_7, %c128] : memref<16x256xbf16, #tpu.memory_space<vmem>>, vector<16x128xbf16>
    tpu.vector_store %arg7[%c0_7, %c128], %4 {strides = array<i32>} : memref<16x256xbf16, #tpu.memory_space<vmem>>, vector<16x128xbf16>,
    %c0_8 = arith.constant 0 : index
    %c0_9 = arith.constant 0 : index
    %6 = vector.load %arg7[%c0_8, %c0_9] : memref<16x256xbf16, #tpu.memory_space<vmem>>, vector<16x128xbf16>
    %c0_10 = arith.constant 0 : index
    %c0_11 = arith.constant 0 : index
    %7 = vector.load %arg8[%c0_10, %c0_11] : memref<144x128xbf16, #tpu.memory_space<vmem>>, vector<16x128xbf16>
    tpu.vector_store %arg8[%c0_10, %c0_11], %6 {strides = array<i32>} : memref<144x128xbf16, #tpu.memory_space<vmem>>, vector<16x128xbf16>,
    %c0_12 = arith.constant 0 : index
    %c1 = arith.constant 1 : index
    %8 = vector.load %arg7[%c0_12, %c1] : memref<16x256xbf16, #tpu.memory_space<vmem>>, vector<16x128xbf16>
    %c16 = arith.constant 16 : index
    %c0_13 = arith.constant 0 : index
    %9 = vector.load %arg8[%c16, %c0_13] : memref<144x128xbf16, #tpu.memory_space<vmem>>, vector<16x128xbf16>
    tpu.vector_store %arg8[%c16, %c0_13], %8 {strides = array<i32>} : memref<144x128xbf16, #tpu.memory_space<vmem>>, vector<16x128xbf16>,
    %c0_14 = arith.constant 0 : index
    %c2 = arith.constant 2 : index
    %10 = vector.load %arg7[%c0_14, %c2] : memref<16x256xbf16, #tpu.memory_space<vmem>>, vector<16x128xbf16>
    %c32 = arith.constant 32 : index
    %c0_15 = arith.constant 0 : index
    %11 = vector.load %arg8[%c32, %c0_15] : memref<144x128xbf16, #tpu.memory_space<vmem>>, vector<16x128xbf16>
    tpu.vector_store %arg8[%c32, %c0_15], %10 {strides = array<i32>} : memref<144x128xbf16, #tpu.memory_space<vmem>>, vector<16x128xbf16>,
    %c0_16 = arith.constant 0 : index
    %c18 = arith.constant 18 : index
    %12 = vector.load %arg7[%c0_16, %c18] : memref<16x256xbf16, #tpu.memory_space<vmem>>, vector<16x128xbf16>
    %c48 = arith.constant 48 : index
    %c0_17 = arith.constant 0 : index
    %13 = vector.load %arg8[%c48, %c0_17] : memref<144x128xbf16, #tpu.memory_space<vmem>>, vector<16x128xbf16>
    tpu.vector_store %arg8[%c48, %c0_17], %12 {strides = array<i32>} : memref<144x128xbf16, #tpu.memory_space<vmem>>, vector<16x128xbf16>,
    %c0_18 = arith.constant 0 : index
    %c19 = arith.constant 19 : index
    %14 = vector.load %arg7[%c0_18, %c19] : memref<16x256xbf16, #tpu.memory_space<vmem>>, vector<16x128xbf16>
    %c64 = arith.constant 64 : index
    %c0_19 = arith.constant 0 : index
    %15 = vector.load %arg8[%c64, %c0_19] : memref<144x128xbf16, #tpu.memory_space<vmem>>, vector<16x128xbf16>
    tpu.vector_store %arg8[%c64, %c0_19], %14 {strides = array<i32>} : memref<144x128xbf16, #tpu.memory_space<vmem>>, vector<16x128xbf16>,
    %c0_20 = arith.constant 0 : index
    %c20 = arith.constant 20 : index
    %16 = vector.load %arg7[%c0_20, %c20] : memref<16x256xbf16, #tpu.memory_space<vmem>>, vector<16x128xbf16>
    %c80 = arith.constant 80 : index
    %c0_21 = arith.constant 0 : index
    %17 = vector.load %arg8[%c80, %c0_21] : memref<144x128xbf16, #tpu.memory_space<vmem>>, vector<16x128xbf16>
    tpu.vector_store %arg8[%c80, %c0_21], %16 {strides = array<i32>} : memref<144x128xbf16, #tpu.memory_space<vmem>>, vector<16x128xbf16>,
    %c0_22 = arith.constant 0 : index
    %c36 = arith.constant 36 : index
    %18 = vector.load %arg7[%c0_22, %c36] : memref<16x256xbf16, #tpu.memory_space<vmem>>, vector<16x128xbf16>
    %c96 = arith.constant 96 : index
    %c0_23 = arith.constant 0 : index
    %19 = vector.load %arg8[%c96, %c0_23] : memref<144x128xbf16, #tpu.memory_space<vmem>>, vector<16x128xbf16>
    tpu.vector_store %arg8[%c96, %c0_23], %18 {strides = array<i32>} : memref<144x128xbf16, #tpu.memory_space<vmem>>, vector<16x128xbf16>,
    %c0_24 = arith.constant 0 : index
    %c37 = arith.constant 37 : index
    %20 = vector.load %arg7[%c0_24, %c37] : memref<16x256xbf16, #tpu.memory_space<vmem>>, vector<16x128xbf16>
    %c112 = arith.constant 112 : index
    %c0_25 = arith.constant 0 : index
    %21 = vector.load %arg8[%c112, %c0_25] : memref<144x128xbf16, #tpu.memory_space<vmem>>, vector<16x128xbf16>
    tpu.vector_store %arg8[%c112, %c0_25], %20 {strides = array<i32>} : memref<144x128xbf16, #tpu.memory_space<vmem>>, vector<16x128xbf16>,
    %c0_26 = arith.constant 0 : index
    %c38 = arith.constant 38 : index
    %22 = vector.load %arg7[%c0_26, %c38] : memref<16x256xbf16, #tpu.memory_space<vmem>>, vector<16x128xbf16>
    %c128_27 = arith.constant 128 : index
    %c0_28 = arith.constant 0 : index
    %23 = vector.load %arg8[%c128_27, %c0_28] : memref<144x128xbf16, #tpu.memory_space<vmem>>, vector<16x128xbf16>
    tpu.vector_store %arg8[%c128_27, %c0_28], %22 {strides = array<i32>} : memref<144x128xbf16, #tpu.memory_space<vmem>>, vector<16x128xbf16>,
    %c0_29 = arith.constant 0 : index
    %c0_30 = arith.constant 0 : index
    %24 = vector.load %arg4[%c0_29, %c0_30] : memref<8x144xbf16, #tpu.memory_space<vmem>>, vector<8x144xbf16>
    %c0_31 = arith.constant 0 : index
    %c0_32 = arith.constant 0 : index
    %25 = vector.load %arg8[%c0_31, %c0_32] : memref<144x128xbf16, #tpu.memory_space<vmem>>, vector<144x128xbf16>
    %cst = arith.constant dense<0.000000e+00> : vector<8x128xf32>
    %26 = tpu.matmul %24, %25, %cst {dimension_numbers = #tpu.dot_dimension_numbers<[1], [0], [0], [1], [0, 0, 1, 1], [], []>} : vector<8x144xbf16>, vector<144x128xbf16>, vector<8x128xf32> -> vector<8x128xf32>
    %c0_33 = arith.constant 0 : index
    %c0_34 = arith.constant 0 : index
    %27 = vector.load %arg5[%c0_33, %c0_34] : memref<8x2xf32, #tpu.memory_space<vmem>>, vector<8x1xf32>
    %c0_35 = arith.constant 0 : index
    %c1_36 = arith.constant 1 : index
    %28 = vector.load %arg5[%c0_35, %c1_36] : memref<8x2xf32, #tpu.memory_space<vmem>>, vector<8x1xf32>
    %29 = vector.broadcast %27 : vector<8x1xf32> to vector<8x128xf32>
    %30 = arith.addf %26, %29 : vector<8x128xf32>
    %cst_37 = arith.constant 0.000000e+00 : f32
    %31 = vector.broadcast %cst_37 : f32 to vector<8x128xf32>
    %32 = arith.cmpf oge, %30, %31 : vector<8x128xf32>
    %33 = vector.broadcast %28 : vector<8x1xf32> to vector<8x128xf32>
    %34 = arith.mulf %33, %30 : vector<8x128xf32>
    %35 = arith.select %32, %30, %34 : vector<8x128xi1>, vector<8x128xf32>
    %c0_38 = arith.constant 0 : index
    %c0_39 = arith.constant 0 : index
    %c0_40 = arith.constant 0 : index
    %36 = vector.load %arg6[%c0_38, %c0_39, %c0_40] : memref<1x8x128xf32, #tpu.memory_space<vmem>>, vector<1x8x128xf32>
    %37 = vector.shape_cast %36 : vector<1x8x128xf32> to vector<8x128xf32>
    %38 = vector.shape_cast %35 : vector<8x128xf32> to vector<1x8x128xf32>
    tpu.vector_store %arg6[%c0_38, %c0_39, %c0_40], %38 {strides = array<i32>} : memref<1x8x128xf32, #tpu.memory_space<vmem>>, vector<1x8x128xf32>,
    return
  }
  func.func @transform_0(%arg0: i32, %arg1: i32) -> (i32, i32, i32) {
    %c0_i32 = arith.constant 0 : i32
    %c0_i32_0 = arith.constant 0 : i32
    return %arg0, %c0_i32, %arg1 : i32, i32, i32
  }
  func.func @transform_1(%arg0: i32, %arg1: i32) -> (i32, i32, i32) {
    %c1_i32 = arith.constant 1 : i32
    %0 = arith.addi %arg1, %c1_i32 : i32
    %c1_i32_0 = arith.constant 1 : i32
    %1 = arith.muli %0, %c1_i32_0 : i32
    %c0_i32 = arith.constant 0 : i32
    %c0_i32_1 = arith.constant 0 : i32
    return %arg0, %c0_i32, %1 : i32, i32, i32
  }
  func.func @transform_2(%arg0: i32, %arg1: i32) -> (i32, i32) {
    %c0_i32 = arith.constant 0 : i32
    %c0_i32_0 = arith.constant 0 : i32
    %c0_i32_1 = arith.constant 0 : i32
    return %c0_i32, %c0_i32_0 : i32, i32
  }
  func.func @transform_3(%arg0: i32, %arg1: i32) -> (i32, i32) {
    %c0_i32 = arith.constant 0 : i32
    %c0_i32_0 = arith.constant 0 : i32
    %c0_i32_1 = arith.constant 0 : i32
    return %c0_i32, %c0_i32_0 : i32, i32
  }
  func.func @transform_4(%arg0: i32, %arg1: i32) -> (i32, i32, i32) {
    %c0_i32 = arith.constant 0 : i32
    %c0_i32_0 = arith.constant 0 : i32
    return %arg0, %c0_i32, %arg1 : i32, i32, i32
  }
}

</mosaic_0001>

<bundles_post_ra>
// kernel: tpu_custom_call.1
= control target key start
LH: loop header
LB: loop body
LE: loop exit
PB: predicated region body
PF: predicated region fallthrough
CT: control target
= control target key end

     0   :  { %s1382_s0 = inlined_call_operand.hbm [shape: bf16[2,16,512], index: 0, kind: input, shape index: {}]   ;;  %s1383_s1 = inlined_call_operand.hbm [shape: bf16[2,16,512], index: 1, kind: input, shape index: {}]   ;;  %s1384_s2 = inlined_call_operand.vmem [shape: bf16[8,144], index: 2, kind: input, shape index: {}]   ;;  %s1385_s3 = inlined_call_operand.vmem [shape: f32[8,2], index: 3, kind: input, shape index: {}]   ;;  %s1386_s4 = inlined_call_operand.hbm [shape: f32[2,8,384], index: 4, kind: output, shape index: {}]  }
   0x1   :  { %1394 = sst [smem:[#allocation19_spill]] %s1382_s0 }
   0x2   :  { %1395 = sst [smem:[#allocation20_spill]] %s1386_s4 }
   0x3   :  { %9 = vsyncpa [#allocation5], 0 }
   0x4   :  { %11 = vsyncpa [#allocation5 + $0x1], 0 }
   0x5   :  { %12 = vsyncpa [#allocation8], 0 }
   0x6   :  { %14 = vsyncpa [#allocation8 + $0x1], 0 }
   0x7   :  { %15 = vsyncpa [#allocation6], 0 }
   0x8   :  { %17 = vsyncpa [#allocation6 + $0x1], 0  ;;  %s1082_s15 = smov 0   ;;  %s1084_s16 = smov 0  }
   0x9   :  { %s1086_s17 = smov 0   ;;  %s1088_s18 = smov 0  }
   0xa   :  { %s1090_s19 = smov 0   ;;  %s1092_s20 = smov 0  }
   0xb   :  { %s1094_s21 = smov 0   ;;  %s1096_s22 = smov 0  }
   0xc   :  { %s1098_s23 = smov 0   ;;  %s1100_s24 = smov 0  }
   0xd   :  { %s1102_s25 = smov 0  }
   0xe LB: > { %1396 = sst [smem:[#allocation13_spill]] %s1023_s21  ;;  %s693_s26 = sadd.s32 4294967295, %s1039_s25   ;;  %s1039_s25 = sphi %s1102_s25, %s23_s25   ;;  %s1035_s24 = sphi %s1100_s24, %s1423_s24   ;;  %s1031_s23 = sphi %s1098_s23, %s1422_s23   ;;  %s1027_s22 = sphi %s1096_s22, %s1421_s22   ;;  %s1023_s21 = sphi %s1094_s21, %s1420_s21   ;;  %s1019_s20 = sphi %s1092_s20, %s1429_s20   ;;  %s1015_s19 = sphi %s1090_s19, %s1428_s19   ;;  %s1011_s18 = sphi %s1088_s18, %s1427_s18   ;;  %s1007_s17 = sphi %s1086_s17, %s1426_s17   ;;  %s1003_s16 = sphi %s1084_s16, %s1425_s16   ;;  %s999_s15 = sphi %s1082_s15, %s1424_s15  }
   0xf   : > { %1397 = sst [smem:[#allocation14_spill]] %s1031_s23  ;;  %s694_s27 = sadd.s32 4294967294, %s1039_s25  }
  0x10   : > { %1398 = sst [smem:[#allocation15_spill]] %s1035_s24  ;;  %s32_s28 = sadd.s32 1, %s1031_s23 }
  0x11   : > { %s35_s29 = sadd.s32 1, %s1035_s24  ;;  %p33_p0 = scmp.ge.s32.totalorder %s32_s28, 3 }
  0x12   : > { %s44_s30 = sadd.s32 1, %s1019_s20  ;;  %p51_p1 = scmp.ne.s32.totalorder %s1019_s20, %s1015_s19 }
  0x13   : > { %p1392_p2 = scmp.eq.s32.totalorder %s1039_s25, 0  ;;  %s1431_s29 = smov (!%p33_p0, %s35_s29), %s1035_s24 }
  0x14   : > { %s1145_s5 = scalar_select %p33_p0, 0, %s32_s28  }
  0x15   : > { %p1155_p3 = por %p1392_p2, %p51_p1  ;;  %p37_p4 = scmp.ge.s32.totalorder %s1431_s29, 2 }
  0x16   : > { %1399 = sst [smem:[#allocation16_spill]] %s1145_s5  ;;  %s40_s6 = ssub.s32 %s1031_s23, %s1145_s5 }
  0x17   : > { %p57_p5 = scmp.ne.s32.totalorder %s1015_s19, %s1011_s18  ;;  %p1161_p6 = scmp.eq.s32.totalorder %s693_s26, 0 }
  0x18   : > { %s68_s9 = sadd.s32 1, %s1145_s5  ;;  %s1433_s29 = smov (%p37_p4, %s1431_s29), 0 }
  0x19   : > { %1402 = sst [smem:[#allocation17_spill]] %s1433_s29  ;;  %p1173_p7 = por %p1161_p6, %p57_p5 }
  0x1a   : > { %s70_s11 = ssub.s32 %s32_s28, %s68_s9  ;;  %s39_s12 = ssub.s32 %s1035_s24, %s1433_s29 }
  0x1b   : > { %p155_p8 = scmp.eq.s32.totalorder %s693_s26, 5  ;;  %s41_s13 = sor.u32 %s40_s6, %s39_s12 }
  0x1c   : > { %s71_s14 = sor.u32 %s70_s11, %s39_s12  ;;  %p42_p9 = scmp.eq.s32.totalorder %s41_s13, 0 }
  0x1d   : > { %p1179_p10 = scmp.eq.s32.totalorder %s71_s14, 0  ;;  %p1186_p11 = por %p155_p8, %p51_p1 }
  0x1e   : > { %p161_p12 = scmp.eq.s32.totalorder %s694_s27, 5  ;;  %p741_p0 = scmp.lt.s32.totalorder %s1039_s25, 6 }
  0x1f   : > { %s1405_s4 = scalar_select %p1186_p11, 1, 0 }
  0x20   : > { %s1191_s21 = scalar_select %p42_p9, %s1019_s20, %s44_s30  }
  0x21   : > { %p1196_p13 = por %p161_p12, %p57_p5  ;;  %s187_s28 = sand.u32 1, %s1019_s20  }
  0x22   : > { %1406 = sst [smem:[#allocation18_spill]] %s1191_s21  ;;  %s697_s6 = sshll.u32 %s187_s28, 3 }
  0x23   : > { %s1407_s26 = scalar_select %p1196_p13, 1, 0 }
  0x24   : > { %s698_s9 = sshll.u32 %s1035_s24, 3  ;;  %s191_s12 = scalar_lea.vmem [#allocation4], %s697_s6 }
  0x25   : > { %s1204_s11 = sadd.s32 %s1031_s23, %s698_s9  ;;  %s199_s13 = sshll.u32 %s191_s12, 4  ;;  %s200_s13 = int_to_ptr.vmem [resolvable:$true] %s199_s13 }
  0x26   : > { %s699_s14 = sshll.u32 %s1204_s11, 6  ;;  %s1408_s0 = sld [smem:[#allocation19_spill]] }
  0x27   : > { %p1216_p1 = pnand %p741_p0, %p1155_p3  ;;  %s188_s9 = scalar_lea.sflag [#allocation5], %s187_s28 }
  0x28   : > { %s871_s24 = scalar_lea.vmem %s200_s13, 128  ;;  %s1041_s6 = smov [#allocation4]  }
  0x29   : > { %p860_p4 = pneg %p1216_p1  ;;  %p872_p5 = scmp.ne.s32.totalorder %s200_s13, %s871_s24 }
  0x2a   : > { %s876_s12 = sshll.u32 %s1041_s6, 4  ;;  %s877_s12 = int_to_ptr.vmem [resolvable:$false] %s876_s12 }
  0x2b   : > { %p874_p8 = pnand %p872_p5, %p860_p4  ;;  %s878_s23 = scalar_lea.vmem %s877_s12, 256 }
  0x2c   : > { %s198_s29 = scalar_lea.hbm %s1408_s0, %s699_s14  ;;  %p879_p12 = scmp.lt.s32.totalorder %s200_s13, %s877_s12 }
  0x2d   : > { %p875_p9 = pneg %p874_p8  ;;  %p880_p2 = scmp.lt.s32.totalorder %s878_s23, %s871_s24 }
  0x2f   : > { %p881_p13 = por %p880_p2, %p879_p12 }
  0x31   : > { %p882_p11 = pnand %p881_p13, %p875_p9 }
  0x33   : > { %885 = shalt.err (!%p882_p11)
}
  0x34   : > { %s1042_s7 = smov 256   ;;  %s1043_s28 = smov 64  }
  0x35   : > { %s1044_s23 = smov 4   ;;  %p703_p2 = scmp.ge.s32.totalorder %s1039_s25, 1 }
  0x36   : > { %733 = dma.hbm_to_vmem [thread:$0]  (!%p1216_p1), %s198_s29, 128, %s200_s13, %s188_s9, %s1042_s7, %s1043_s28, %s1044_s23  }
  0x37   : > { %p230_p3 = scmp.lt.s32.totalorder %s1039_s25, 7  ;;  %s74_s27 = sadd.s32 1, %s1007_s17 }
  0x38   : > { %s1237_s30 = scalar_select %p1179_p10, %s1007_s17, %s74_s27  }
  0x39   : > { %p1229_p11 = pnand %p703_p2, %p230_p3  ;;  %p81_p13 = scmp.ne.s32.totalorder %s1007_s17, %s1003_s16 }
  0x3a   : > { %p87_p4 = scmp.ne.s32.totalorder %s1003_s16, %s999_s15  ;;  %s209_s6 = sand.u32 1, %s1007_s17  }
  0x3b   : > { %s1249_s0 = scalar_lea.hbm %s1383_s1, %s699_s14  ;;  %p1411_p1 = scmp.eq.s32.totalorder %s1039_s25, 0 }
  0x3c   : > { %p1255_p8 = por %p87_p4, %p1161_p6  ;;  %s700_s5 = sshll.u32 %s209_s6, 3 }
  0x3d   : > { %p83_p5 = por %p81_p13, %p1411_p1  ;;  %s623_s13 = scalar_lea.hbm %s1249_s0, 64 }
  0x3e   : > { %s213_s9 = scalar_lea.vmem [#allocation7], %s700_s5  ;;  %s210_s11 = scalar_lea.sflag [#allocation8], %s209_s6 }
  0x3f   : > { %s222_s27 = sshll.u32 %s213_s9, 4  ;;  %p1262_p10 = pnand %p741_p0, %p83_p5  ;;  %s223_s27 = int_to_ptr.vmem [resolvable:$true] %s222_s27 }
  0x40   : > { %s899_s14 = scalar_lea.vmem %s223_s27, 128  ;;  %s1045_s8 = smov [#allocation7]  }
  0x41   : > { %p888_p9 = pneg %p1262_p10  ;;  %p900_p12 = scmp.ne.s32.totalorder %s223_s27, %s899_s14 }
  0x42   : > { %s904_s21 = sshll.u32 %s1045_s8, 4  ;;  %s905_s21 = int_to_ptr.vmem [resolvable:$false] %s904_s21 }
  0x43   : > { %p902_p6 = pnand %p900_p12, %p888_p9  ;;  %s906_s0 = scalar_lea.vmem %s905_s21, 256 }
  0x44   : > { %p907_p3 = scmp.lt.s32.totalorder %s223_s27, %s905_s21  ;;  %p908_p13 = scmp.lt.s32.totalorder %s906_s0, %s899_s14 }
  0x45   : > { %p903_p2 = pneg %p902_p6 }
  0x46   : > { %p909_p4 = por %p908_p13, %p907_p3 }
  0x48   : > { %p910_p0 = pnand %p909_p4, %p903_p2 }
  0x4a   : > { %913 = shalt.err (!%p910_p0)
}
  0x4b   : > { %736 = dma.hbm_to_vmem [thread:$0]  (!%p1262_p10), %s623_s13, 128, %s223_s27, %s210_s11, %s1042_s7, %s1043_s28, %s1044_s23  }
  0x4c   : > { %234 = sbr.rel (%p1229_p11) target bundleno = 471 (0x1d7), region = 36  ;;  %s1276_s6 = sand.u32 (!%p1229_p11), 1, %s1015_s19  }
  0x4d   : > { %s704_s12 = sshll.u32 (!%p1229_p11), %s1276_s6, 3  ;;  %s237_s5 = scalar_lea.sflag (!%p1229_p11), [#allocation5], %s1276_s6 }
  0x4e   : > { %s240_s9 = scalar_lea.vmem (!%p1229_p11), [#allocation4], %s704_s12 }
  0x51   : > { %986 = dma.done.wait (%p1173_p7), %s237_s5, 128  }
  0x52   : > { %988 = vsyncadd (%p1173_p7), %s237_s5, 4294967168  ;;  %s245_s7 = sand.u32 1, %s1003_s16  }
  0x53   : > { %s705_s28 = sshll.u32 %s245_s7, 3  ;;  %s246_s23 = scalar_lea.sflag [#allocation8], %s245_s7 }
  0x54   : > { %s249_s24 = scalar_lea.vmem [#allocation7], %s705_s28 }
  0x55   : > { %990 = dma.done.wait (%p1255_p8), %s246_s23, 128  }
  0x56   : > { %992 = vsyncadd (%p1255_p8), %s246_s23, 4294967168  ;;  %v281_v0 = vld [vmem:[%s240_s9] sm:$0xf]  ;;  %v285_v1 = vld [vmem:[%s249_s24] sm:$0xf]  ;;  %s1046_s10 = smov 91  }
  0x57   : > { %v282_v2 = vld [vmem:[%s240_s9 + $0x4] sm:$0xf]  ;;  %283 = vst [vmem:[#allocation2] sm:$0xf] %v281_v0  ;;  %287 = vst [vmem:[#allocation2 + $0x4] sm:$0xf] %v285_v1 }
  0x58   : > { %284 = vst [vmem:[#allocation2 + $0x8] sm:$0xf] %v282_v2  ;;  %v286_v3 = vld [vmem:[%s249_s24 + $0x4] sm:$0xf]  ;;  %s1047_s13 = smov 92   ;;  %v1048_v6 = vmov 0  }
  0x59   : > { %288 = vst [vmem:[#allocation2 + $0xc] sm:$0xf] %v286_v3  ;;  %518 = vmatprep.subr.bf16.mxu0 %v1048_v6  ;;  %844 = vset.pattern.permute.xlu0 %v1048_v6  ;;  %s1049_s29 = smov 108   ;;  %s1050_s27 = smov 109   ;;  %v1296_v9 = vld [vmem:[%s1384_s2] sm:$0xff]  ;;  %vm514_vm0 = vcmask 130048  }
  0x5a   : > { %s1051_s15 = smov 110   ;;  %s1052_s11 = smov 126   ;;  %v708_v10 = vcombine.high %v1296_v9, %v1296_v9  ;;  %v448_v11 = vld [vmem:[%s1385_s3] sm:$0xff]  ;;  %v1055_v12 = vmov 1   ;;  %vm405_vm1 = vcmask 744448   ;;  %vm388_vm2 = vcmask 752640  }
  0x5b   : > { %s1053_s14 = smov 127   ;;  %s1054_s8 = smov 90   ;;  %845 = vset.pattern.permute.xlu1 %v1055_v12  ;;  %vm371_vm3 = vcmask 883712   ;;  %vm354_vm4 = vcmask 891904   ;;  %vm337_vm5 = vcmask 900096   ;;  %vm320_vm6 = vcmask 1031168  }
  0x5c   : > { %718 = vmatprep.mubr.msk.bf16.mxu0 %vm514_vm0, %v708_v10  ;;  %vm303_vm7 = vcmask 1039360   ;;  %vm422_vm8 = vcmask 736256   ;;  %s1414_s7 = sld [smem:[#allocation13_spill]]  ;;  %s723_s28 = smul.u32 3, %s1027_s22 }
  0x5d   : > { %s567_s22 = scalar_lea.sflag [#allocation6], %s1276_s6  ;;  %p1417_p11 = scmp.ne.s32.totalorder %s1405_s4, 0 }
  0x5e   : > { %v395_v4 = vld [vmem:[#allocation2] sm:$0xff] }
  0x5f   : > { %399 = vrot.lane.b32.xlu0 %v395_v4, %s1046_s10  ;;  %382 = vrot.lane.b32.xlu1 %v395_v4, %s1047_s13  ;;  %v289_v7 = vld [vmem:[#allocation2] sm:$0xf]  ;;  %v290_v8 = vld [vmem:[#allocation2 + $0x8] sm:$0xf] }
  0x60   : > { %v396_v5 = vld [vmem:[#allocation2 + $0x8] sm:$0xff]  ;;  %291 = vst [vmem:[#allocation3] sm:$0xf] %v289_v7  ;;  %292 = vst [vmem:[#allocation3 + $0x4] sm:$0xf] %v290_v8  ;;  %v707_v7 = vcombine.low %v1296_v9, %v1296_v9 }
  0x62   : > { %s578_s23 = sadd.s32 %s1414_s7, %s723_s28 }
  0x63   : > { %401 = vrot.lane.b32.xlu0 %v396_v5, %s1046_s10  ;;  %384 = vrot.lane.b32.xlu1 %v396_v5, %s1047_s13  ;;  %s720_s24 = sshll.u32 %s578_s23, 7  ;;  %s278_s10 = scalar_lea.vmem [#allocation9], %s704_s12 }
  0x64   : > { %s582_s13 = sshll.u32 %s278_s10, 4  ;;  %s1322_s13 = int_to_ptr.vmem [resolvable:$true] %s582_s13 }
  0x65   : > { %s915_s12 = scalar_lea.vmem %s1322_s13, 128 }
  0x66   : > { %p916_p7 = scmp.ne.s32.totalorder %s1322_s13, %s915_s12 }
  0x67   : > { %367 = vrot.lane.b32.xlu1 %v396_v5, %s1049_s29  ;;  %365 = vrot.lane.b32.xlu0 %v395_v4, %s1049_s29 }
  0x68   : > { %p917_p1 = pnand %p916_p7, %p1417_p11 }
  0x6a   : > { %p918_p5 = pneg %p917_p1 }
  0x6b   : > { %350 = vrot.lane.b32.xlu1 %v396_v5, %s1050_s27  ;;  %348 = vrot.lane.b32.xlu0 %v395_v4, %s1050_s27 }
  0x6f   : > { %333 = vrot.lane.b32.xlu1 %v396_v5, %s1051_s15  ;;  %331 = vrot.lane.b32.xlu0 %v395_v4, %s1051_s15  ;;  %s1415_s15 = sld [smem:[#allocation20_spill]] }
  0x73   : > { %316 = vrot.lane.b32.xlu1 %v396_v5, %s1052_s11  ;;  %314 = vrot.lane.b32.xlu0 %v395_v4, %s1052_s11 }
  0x75   : > { %s1416_s11 = smov %s1415_s15 }
  0x77   : > { %299 = vrot.lane.b32.xlu1 %v396_v5, %s1053_s14  ;;  %297 = vrot.lane.b32.xlu0 %v395_v4, %s1053_s14  ;;  %s1320_s14 = scalar_lea.hbm %s1415_s15, %s720_s24 }
  0x7b   : > { %418 = vrot.lane.b32.xlu1 %v396_v5, %s1054_s8  ;;  %416 = vrot.lane.b32.xlu0 %v395_v4, %s1054_s8  ;;  %v854_v4 = vld [vmem:[#allocation3] sm:$0xff]   ;;  %s1056_s8 = smov [#allocation9]  }
  0x7c   : > { %s919_s21 = sshll.u32 %s1056_s8, 4  ;;  %s920_s21 = int_to_ptr.vmem [resolvable:$false] %s919_s21 }
  0x7d   : > { %s921_s0 = scalar_lea.vmem %s920_s21, 256  ;;  %p922_p8 = scmp.lt.s32.totalorder %s1322_s13, %s920_s21 }
  0x7e   : > { %p923_p10 = scmp.lt.s32.totalorder %s921_s0, %s915_s12 }
  0x7f   : > { %451 = vperm.xlu0 %844, %v448_v11   ;;  %560 = vperm.xlu1 %845, %v448_v11  }
  0x80   : > { %p924_p9 = por %p923_p10, %p922_p8 }
  0x82   : > { %p925_p12 = pnand %p924_p9, %p918_p5 }
  0x83   : > { %846 = vset.pattern.permute.xlu0 %v1055_v12 }
  0xd1   : > { %v400_v13 = vpop.permute.xlu0 %399  ;;  %v383_v14 = vpop.permute.xlu1 %382 }
  0xd2   : > { %v403_v15 = vrot.slane %v400_v13, 4  ;;  %v386_v16 = vrot.slane %v383_v14, 4 }
  0xd4   : > { %v406_v17 = vsel %vm405_vm1, %v400_v13, %v403_v15  ;;  %v389_v18 = vsel %vm388_vm2, %v383_v14, %v386_v16 }
  0xd5   : > { %410 = vst [vmem:[#allocation3 + $0x38] sm:$0xf] %v406_v17  ;;  %393 = vst [vmem:[#allocation3 + $0x30] sm:$0xf] %v389_v18  ;;  %v402_v19 = vpop.permute.xlu0 %401  ;;  %v385_v20 = vpop.permute.xlu1 %384 }
  0xd6   : > { %v404_v21 = vrot.slane %v402_v19, 4  ;;  %v387_v22 = vrot.slane %v385_v20, 4 }
  0xd8   : > { %v407_v23 = vsel %vm405_vm1, %v402_v19, %v404_v21  ;;  %v390_v24 = vsel %vm388_vm2, %v385_v20, %v387_v22 }
  0xd9   : > { %411 = vst [vmem:[#allocation3 + $0x3c] sm:$0xf] %v407_v23  ;;  %394 = vst [vmem:[#allocation3 + $0x34] sm:$0xf] %v390_v24  ;;  %v368_v25 = vpop.permute.xlu1 %367  ;;  %v366_v26 = vpop.permute.xlu0 %365 }
  0xda   : > { %v370_v27 = vrot.slane %v368_v25, 4  ;;  %v369_v28 = vrot.slane %v366_v26, 4 }
  0xdc   : > { %v373_v29 = vsel %vm371_vm3, %v368_v25, %v370_v27  ;;  %v372_v30 = vsel %vm371_vm3, %v366_v26, %v369_v28 }
  0xdd   : > { %377 = vst [vmem:[#allocation3 + $0x2c] sm:$0xf] %v373_v29  ;;  %376 = vst [vmem:[#allocation3 + $0x28] sm:$0xf] %v372_v30  ;;  %v351_v31 = vpop.permute.xlu1 %350  ;;  %v349_v32 = vpop.permute.xlu0 %348 }
  0xde   : > { %v353_v33 = vrot.slane %v351_v31, 4  ;;  %v352_v34 = vrot.slane %v349_v32, 4 }
  0xe0   : > { %v356_v35 = vsel %vm354_vm4, %v351_v31, %v353_v33  ;;  %v355_v36 = vsel %vm354_vm4, %v349_v32, %v352_v34  ;;  %v847_v37 = vld [vmem:[#allocation3 + $0x38] sm:$0xff]   ;;  %v848_v44 = vld [vmem:[#allocation3 + $0x30] sm:$0xff]  }
  0xe1   : > { %360 = vst [vmem:[#allocation3 + $0x24] sm:$0xf] %v356_v35  ;;  %359 = vst [vmem:[#allocation3 + $0x20] sm:$0xf] %v355_v36  ;;  %v334_v38 = vpop.permute.xlu1 %333  ;;  %v332_v39 = vpop.permute.xlu0 %331  ;;  %519 = vmatpush1.bf16.msra.mxu0 %v847_v37 }
  0xe2   : > { %v336_v40 = vrot.slane %v334_v38, 4  ;;  %v335_v41 = vrot.slane %v332_v39, 4  ;;  %520 = vmatprep.subr.bf16.mxu0 %v1048_v6 }
  0xe4   : > { %v339_v42 = vsel %vm337_vm5, %v334_v38, %v336_v40  ;;  %v338_v43 = vsel %vm337_vm5, %v332_v39, %v335_v41  ;;  %v849_v51 = vld [vmem:[#allocation3 + $0x28] sm:$0xff]  }
  0xe5   : > { %343 = vst [vmem:[#allocation3 + $0x1c] sm:$0xf] %v339_v42  ;;  %342 = vst [vmem:[#allocation3 + $0x18] sm:$0xf] %v338_v43  ;;  %v317_v45 = vpop.permute.xlu1 %316  ;;  %v315_v46 = vpop.permute.xlu0 %314  ;;  %521 = vmatpush1.bf16.msra.mxu0 %v848_v44 }
  0xe6   : > { %v319_v47 = vrot.slane %v317_v45, 4  ;;  %v318_v48 = vrot.slane %v315_v46, 4  ;;  %522 = vmatprep.subr.bf16.mxu0 %v1048_v6 }
  0xe8   : > { %v322_v49 = vsel %vm320_vm6, %v317_v45, %v319_v47  ;;  %v321_v50 = vsel %vm320_vm6, %v315_v46, %v318_v48  ;;  %v850_v58 = vld [vmem:[#allocation3 + $0x20] sm:$0xff]  }
  0xe9   : > { %326 = vst [vmem:[#allocation3 + $0x14] sm:$0xf] %v322_v49  ;;  %325 = vst [vmem:[#allocation3 + $0x10] sm:$0xf] %v321_v50  ;;  %v300_v52 = vpop.permute.xlu1 %299  ;;  %v298_v53 = vpop.permute.xlu0 %297  ;;  %523 = vmatpush1.bf16.msra.mxu0 %v849_v51 }
  0xea   : > { %v302_v54 = vrot.slane %v300_v52, 4  ;;  %v301_v55 = vrot.slane %v298_v53, 4  ;;  %524 = vmatprep.subr.bf16.mxu0 %v1048_v6 }
  0xec   : > { %v305_v56 = vsel %vm303_vm7, %v300_v52, %v302_v54  ;;  %v304_v57 = vsel %vm303_vm7, %v298_v53, %v301_v55  ;;  %v851_v0 = vld [vmem:[#allocation3 + $0x18] sm:$0xff]  }
  0xed   : > { %309 = vst [vmem:[#allocation3 + $0xc] sm:$0xf] %v305_v56  ;;  %308 = vst [vmem:[#allocation3 + $0x8] sm:$0xf] %v304_v57  ;;  %v419_v59 = vpop.permute.xlu1 %418  ;;  %v417_v60 = vpop.permute.xlu0 %416  ;;  %525 = vmatpush1.bf16.msra.mxu0 %v850_v58 }
  0xee   : > { %v421_v61 = vrot.slane %v419_v59, 4  ;;  %v420_v62 = vrot.slane %v417_v60, 4  ;;  %526 = vmatprep.subr.bf16.mxu0 %v1048_v6 }
  0xf0   : > { %v424_v63 = vsel %vm422_vm8, %v419_v59, %v421_v61  ;;  %v423_v1 = vsel %vm422_vm8, %v417_v60, %v420_v62  ;;  %v852_v2 = vld [vmem:[#allocation3 + $0x10] sm:$0xff]  }
  0xf1   : > { %428 = vst [vmem:[#allocation3 + $0x44] sm:$0xf] %v424_v63  ;;  %427 = vst [vmem:[#allocation3 + $0x40] sm:$0xf] %v423_v1  ;;  %527 = vmatpush1.bf16.msra.mxu0 %v851_v0 }
  0xf2   : > { %528 = vmatprep.subr.bf16.mxu0 %v1048_v6 }
  0xf4   : > { %v853_v3 = vld [vmem:[#allocation3 + $0x8] sm:$0xff]  }
  0xf5   : > { %529 = vmatpush1.bf16.msra.mxu0 %v852_v2 }
  0xf6   : > { %530 = vmatprep.subr.bf16.mxu0 %v1048_v6 }
  0xf8   : > { %v855_v5 = vld [vmem:[#allocation3 + $0x40] sm:$0xff]  }
  0xf9   : > { %531 = vmatpush1.bf16.msra.mxu0 %v853_v3 }
  0xfa   : > { %532 = vmatprep.subr.bf16.mxu0 %v1048_v6  ;;  %v452_v8 = vpop.permute.xlu0 %451  ;;  %v561_v11 = vpop.permute.xlu1 %560 }
  0xfd   : > { %533 = vmatpush1.bf16.msra.mxu0 %v854_v4 }
  0xfe   : > { %548 = vmatprep.subr.bf16.mxu0 %v1048_v6 }
 0x101   : > { %549 = vmatpush2.bf16.msra.mxu0 %v855_v5 }
 0x104   : > { %551 = vmatmul.mubr.bf16.vlgmr.msra.gmra.mxu0 %v707_v7 }
 0x1c4   : > { %v552_v10 = vpop.f32.mrf.mxu0 }
 0x1c5   : > { %v553_v12 = vadd.f32 %v552_v10, %v452_v8 }
 0x1c6   : > { %v554_v13 = vpop.f32.mrf.mxu0 }
 0x1c7   : > { %vm558_vm9 = vcmp.ge.f32.partialorder %v553_v12, 0.0  ;;  %v563_v6 = vmul.f32 %v561_v11, %v553_v12 }
 0x1c8   : > { %v555_v14 = vpop.f32.mrf.mxu0 }
 0x1c9   : > { %v564_v9 = vsel %vm558_vm9, %v553_v12, %v563_v6 }
 0x1ca   : > { %v556_v15 = vpop.f32.mrf.mxu0  ;;  %565 = vst [vmem:[%s278_s10] sm:$0xff] %v564_v9 }
 0x1cb   : > { %928 = shalt.err (!%p925_p12)
}
 0x1cc   : > { %s929_s5 = scalar_lea.hbm %s1320_s14, 128  ;;  %s933_s7 = scalar_lea.hbm %s1416_s11, 768 }
 0x1cd   : > { %p930_p6 = scmp.ne.s32.totalorder %s1320_s14, %s929_s5  ;;  %p934_p13 = scmp.lt.s32.totalorder %s1320_s14, %s1416_s11 }
 0x1ce   : > { %p935_p4 = scmp.lt.s32.totalorder %s933_s7, %s929_s5 }
 0x1cf   : > { %p931_p2 = pnand %p930_p6, %p1417_p11 }
 0x1d0   : > { %p936_p0 = por %p935_p4, %p934_p13 }
 0x1d1   : > { %p932_p3 = pneg %p931_p2 }
 0x1d3   : > { %p937_p7 = pnand %p936_p0, %p932_p3 }
 0x1d5   : > { %940 = shalt.err (!%p937_p7)
}
 0x1d6   : > { %728 = dma.vmem_to_hbm [thread:$0]  (%p1417_p11), %s1322_s13, 128, %s1320_s14, %s567_s22  }
 0x1d7 PF: > { %p742_p1 = scmp.ge.s32.totalorder %s1039_s25, 2  ;;  %s594_s24 = sand.u32 1, %s1011_s18  }
 0x1d8   : > { %p1418_p5 = scmp.ne.s32.totalorder %s1407_s26, 0  ;;  %s595_s10 = scalar_lea.sflag [#allocation6], %s594_s24 }
 0x1da   : > { %p738_p8 = pnand %p742_p1, %p1418_p5 }
 0x1dc   : > { %p739_p10 = pneg %p738_p8 }
 0x1de   : > { %994 = dma.done.wait (%p739_p10), %s595_s10, 128  }
 0x1df   : > { %996 = vsyncadd (%p739_p10), %s595_s10, 4294967168  ;;  %s23_s25 = sadd.s32 1, %s1039_s25   ;;  %s1419_s4 = sld [smem:[#allocation18_spill]] }
 0x1e0   : > { %p20_p9 = scmp.ge.s32.totalorder %s23_s25, 8   ;;  %s1420_s21 = sld [smem:[#allocation14_spill]] }
 0x1e1   : > { %s1421_s22 = sld [smem:[#allocation15_spill]]  ;;  %s1424_s15 = smov %s1003_s16 }
 0x1e2   : > { %s1422_s23 = sld [smem:[#allocation16_spill]]  ;;  %s1425_s16 = smov %s1007_s17 }
 0x1e3   : > { %s1423_s24 = sld [smem:[#allocation17_spill]]  ;;  %s1426_s17 = smov %s1237_s30 }
 0x1e4   : > { %s1427_s18 = smov %s1015_s19  ;;  %s1428_s19 = smov %s1019_s20 }
 0x1e5   : > { %s1429_s20 = smov %s1419_s4  ;;  %22 = sbr.rel (!%p20_p9) target bundleno = 14 (0xe), region = 94 }
 0x1ea   :  { %600 = vsyncpa [#allocation5], 1 }
 0x1eb   :  { %602 = vsyncpa [#allocation5 + $0x1], 1 }
 0x1ec   :  { %603 = vsyncpa [#allocation8], 1 }
 0x1ed   :  { %605 = vsyncpa [#allocation8 + $0x1], 1 }
 0x1ee   :  { %606 = vsyncpa [#allocation6], 1 }
 0x1ef   :  { %608 = vsyncpa [#allocation6 + $0x1], 1 }

</bundles_post_ra>
